<compile_context>
chip_gen: v5e
topology: v5e:2x2
jax: 0.10.0
libtpu: 0.0.40
codegen_flags: <defaults>
</compile_context>

<pallas_src>
import jax
import jax.numpy as jnp
from jax import lax
from jax.experimental import pallas as pl
from jax.experimental.pallas import tpu as pltpu

LANES = 128
SUBLANES = 8
MAX_ROW_TILE = 2048   # rows of 128 lanes per grid step (1 MiB f32 per input block)


def _round_up(x: int, m: int) -> int:
    return (x + m - 1) // m * m


def _make_mse_kernel(rows_valid: int, row_tile: int, tiles_per_shard: int,
                     need_mask: bool):
    def kernel(t_ref, p_ref, o_ref, acc_ref):
        i = pl.program_id(1)

        # Zero the (8, 128) VMEM accumulator at the start of each shard's pass.
        @pl.when(i == 0)
        def _():
            acc_ref[...] = jnp.zeros_like(acc_ref)

        # Cast-on-load (no-op for f32 inputs) and squared difference on the VPU.
        d = p_ref[...].astype(jnp.float32) - t_ref[...].astype(jnp.float32)
        dd = d * d

        if need_mask:
            # Zero rows past the logical end of the data (ragged last tile
            # and/or a duplicated clamped tile from an uneven shard split).
            g = pl.program_id(0) * tiles_per_shard + i   # unclamped tile index
            row_start = g * row_tile
            row_idx = lax.broadcasted_iota(jnp.int32, (row_tile, LANES), 0)
            dd = jnp.where(row_start + row_idx < rows_valid, dd, 0.0)

        # Fold the tile into the vreg-shaped accumulator: VPU adds only,
        # no cross-lane work in the steady state.
        acc_ref[...] += jnp.sum(
            dd.reshape(row_tile // SUBLANES, SUBLANES, LANES), axis=0)

        # Emit this shard's partial sums once, on its last grid step.
        @pl.when(i == pl.num_programs(1) - 1)
        def _():
            o_ref[0] = acc_ref[...]

    return kernel


def mean_square_error(target: jax.Array, prediction: jax.Array) -> jax.Array:
    """Equivalent of torch.nn.MSELoss()(prediction, target).mean()."""
    assert target.shape == prediction.shape, "MSELoss requires matching shapes"
    n_elements = int(target.size)

    t = target.reshape(-1)
    p = prediction.reshape(-1)
    if t.dtype != p.dtype:                       # rare: promote to common dtype
        dt = jnp.promote_types(t.dtype, p.dtype)
        t, p = t.astype(dt), p.astype(dt)

    # Sublane-packing multiple for the row tile (f32 -> 8, bf16 -> 16, int8 -> 32).
    itemsize = jnp.dtype(t.dtype).itemsize
    sub_mult = SUBLANES * max(1, 4 // itemsize)

    # Lane-dense (rows, 128) view.  Zero-copy when N % 128 == 0; otherwise pad
    # only the small ragged tail to the next lane multiple (never a full-tile pad).
    n_lanes = _round_up(n_elements, LANES)
    if n_lanes != n_elements:
        t = jnp.pad(t, (0, n_lanes - n_elements))
        p = jnp.pad(p, (0, n_lanes - n_elements))
    rows = n_lanes // LANES
    t2 = t.reshape(rows, LANES)
    p2 = p.reshape(rows, LANES)

    row_tile = min(MAX_ROW_TILE, _round_up(rows, sub_mult))
    total_tiles = pl.cdiv(rows, row_tile)
    num_shards = 2 if total_tiles >= 2 else 1    # v7x: one shard per TensorCore
    tiles_per_shard = pl.cdiv(total_tiles, num_shards)
    need_mask = (rows % row_tile != 0) or (num_shards * tiles_per_shard != total_tiles)

    def in_index_map(s, i):
        # Clamp so an uneven shard split never indexes past the array; the
        # duplicated tile is fully masked to zero inside the kernel.
        return (jnp.minimum(s * tiles_per_shard + i, total_tiles - 1), 0)

    kernel = _make_mse_kernel(rows, row_tile, tiles_per_shard, need_mask)

    partials = pl.pallas_call(
        kernel,
        out_shape=jax.ShapeDtypeStruct((num_shards, SUBLANES, LANES), jnp.float32),
        grid_spec=pltpu.PrefetchScalarGridSpec(
            num_scalar_prefetch=0,
            grid=(num_shards, tiles_per_shard),
            in_specs=[
                pl.BlockSpec((row_tile, LANES), in_index_map),
                pl.BlockSpec((row_tile, LANES), in_index_map),
            ],
            out_specs=pl.BlockSpec((1, SUBLANES, LANES), lambda s, i: (s, 0, 0)),
            scratch_shapes=[pltpu.VMEM((SUBLANES, LANES), jnp.float32)],
        ),
        compiler_params=pltpu.CompilerParams(
            dimension_semantics=("parallel", "arbitrary"),
        ),
    )(t2, p2)

    # Tiny final combine outside the hot path: sum of the per-shard (8, 128)
    # partial sums, scaled by 1/N.
    return jnp.sum(partials) * jnp.float32(1.0 / n_elements)


if __name__ == "__main__":
    key = jax.random.PRNGKey(0)
    k_t, k_p = jax.random.split(key)

    # Small NCHW shapes consistent with the module's forward (target, prediction).
    shape = (2, 4, 16, 16)
    target = jax.random.normal(k_t, shape, dtype=jnp.float32)
    prediction = jax.random.normal(k_p, shape, dtype=jnp.float32)

    loss = mean_square_error(target, prediction)
    jax.block_until_ready(loss)

    # Reference check in plain JAX.
    ref = jnp.mean((prediction - target) ** 2)
    assert jnp.allclose(loss, ref, rtol=1e-5, atol=1e-6), (loss, ref)

    print("KERNEL_OK")
</pallas_src>

<mosaic_0001>
module attributes {stable_mosaic.version = 11 : i64} {
  func.func @kernel(%arg0: i32, %arg1: i32, %arg2: memref<16x128xf32, #tpu.memory_space<vmem>>, %arg3: memref<16x128xf32, #tpu.memory_space<vmem>>, %arg4: memref<1x8x128xf32, #tpu.memory_space<vmem>>, %arg5: memref<8x128xf32, #tpu.memory_space<vmem>>) attributes {dimension_semantics = [#tpu.dimension_semantics<parallel>, #tpu.dimension_semantics<arbitrary>], iteration_bounds = array<i64: 1, 1>, scalar_prefetch = 0 : i64, scratch_operands = 1 : i64, tpu.core_type = #tpu.core_type<tc>, window_params = [{transform_indices = @transform_0, window_bounds = array<i64: 16, 128>}, {transform_indices = @transform_1, window_bounds = array<i64: 16, 128>}, {transform_indices = @transform_2, window_bounds = array<i64: 1, 8, 128>}]} {
    %c0_i32 = arith.constant 0 : i32
    %0 = arith.cmpi eq, %arg1, %c0_i32 : i32
    %1 = arith.extui %0 : i1 to i32
    %c0_i32_0 = arith.constant 0 : i32
    %2 = arith.cmpi ne, %1, %c0_i32_0 : i32
    scf.if %2 {
      %cst_10 = arith.constant 0.000000e+00 : f32
      %15 = vector.broadcast %cst_10 : f32 to vector<8x128xf32>
      %c0_11 = arith.constant 0 : index
      %c0_12 = arith.constant 0 : index
      %16 = vector.load %arg5[%c0_11, %c0_12] : memref<8x128xf32, #tpu.memory_space<vmem>>, vector<8x128xf32>
      tpu.vector_store %arg5[%c0_11, %c0_12], %15 {strides = array<i32>} : memref<8x128xf32, #tpu.memory_space<vmem>>, vector<8x128xf32>,
    } else {
    }
    %c0 = arith.constant 0 : index
    %c0_1 = arith.constant 0 : index
    %3 = vector.load %arg3[%c0, %c0_1] : memref<16x128xf32, #tpu.memory_space<vmem>>, vector<16x128xf32>
    %c0_2 = arith.constant 0 : index
    %c0_3 = arith.constant 0 : index
    %4 = vector.load %arg2[%c0_2, %c0_3] : memref<16x128xf32, #tpu.memory_space<vmem>>, vector<16x128xf32>
    %5 = arith.subf %3, %4 : vector<16x128xf32>
    %6 = arith.mulf %5, %5 : vector<16x128xf32>
    %c0_4 = arith.constant 0 : index
    %c0_5 = arith.constant 0 : index
    %7 = vector.load %arg5[%c0_4, %c0_5] : memref<8x128xf32, #tpu.memory_space<vmem>>, vector<8x128xf32>
    %8 = vector.shape_cast %6 : vector<16x128xf32> to vector<2x8x128xf32>
    %cst = arith.constant dense<0.000000e+00> : vector<8x128xf32>
    %9 = vector.multi_reduction <add>, %8, %cst [0] : vector<2x8x128xf32> to vector<8x128xf32>
    %10 = arith.addf %7, %9 : vector<8x128xf32>
    %c0_6 = arith.constant 0 : index
    %c0_7 = arith.constant 0 : index
    %11 = vector.load %arg5[%c0_6, %c0_7] : memref<8x128xf32, #tpu.memory_space<vmem>>, vector<8x128xf32>
    tpu.vector_store %arg5[%c0_6, %c0_7], %10 {strides = array<i32>} : memref<8x128xf32, #tpu.memory_space<vmem>>, vector<8x128xf32>,
    %c0_i32_8 = arith.constant 0 : i32
    %12 = arith.cmpi eq, %arg1, %c0_i32_8 : i32
    %13 = arith.extui %12 : i1 to i32
    %c0_i32_9 = arith.constant 0 : i32
    %14 = arith.cmpi ne, %13, %c0_i32_9 : i32
    scf.if %14 {
      %c0_10 = arith.constant 0 : index
      %c0_11 = arith.constant 0 : index
      %15 = vector.load %arg5[%c0_10, %c0_11] : memref<8x128xf32, #tpu.memory_space<vmem>>, vector<8x128xf32>
      %c0_12 = arith.constant 0 : index
      %c0_13 = arith.constant 0 : index
      %c0_14 = arith.constant 0 : index
      %16 = vector.load %arg4[%c0_12, %c0_13, %c0_14] : memref<1x8x128xf32, #tpu.memory_space<vmem>>, vector<1x8x128xf32>
      %17 = vector.shape_cast %16 : vector<1x8x128xf32> to vector<8x128xf32>
      %18 = vector.shape_cast %15 : vector<8x128xf32> to vector<1x8x128xf32>
      tpu.vector_store %arg4[%c0_12, %c0_13, %c0_14], %18 {strides = array<i32>} : memref<1x8x128xf32, #tpu.memory_space<vmem>>, vector<1x8x128xf32>,
    } else {
    }
    return
  }
  func.func @transform_0(%arg0: i32, %arg1: i32) -> (i32, i32) {
    %c1_i32 = arith.constant 1 : i32
    %0 = arith.muli %arg0, %c1_i32 : i32
    %1 = arith.addi %0, %arg1 : i32
    %c0_i32 = arith.constant 0 : i32
    %2 = arith.minsi %1, %c0_i32 : i32
    %c0_i32_0 = arith.constant 0 : i32
    %c0_i32_1 = arith.constant 0 : i32
    return %2, %c0_i32_0 : i32, i32
  }
  func.func @transform_1(%arg0: i32, %arg1: i32) -> (i32, i32) {
    %c1_i32 = arith.constant 1 : i32
    %0 = arith.muli %arg0, %c1_i32 : i32
    %1 = arith.addi %0, %arg1 : i32
    %c0_i32 = arith.constant 0 : i32
    %2 = arith.minsi %1, %c0_i32 : i32
    %c0_i32_0 = arith.constant 0 : i32
    %c0_i32_1 = arith.constant 0 : i32
    return %2, %c0_i32_0 : i32, i32
  }
  func.func @transform_2(%arg0: i32, %arg1: i32) -> (i32, i32, i32) {
    %c0_i32 = arith.constant 0 : i32
    %c0_i32_0 = arith.constant 0 : i32
    %c0_i32_1 = arith.constant 0 : i32
    return %arg0, %c0_i32, %c0_i32_0 : i32, i32, i32
  }
}

</mosaic_0001>

<bundles_post_ra>
// kernel: tpu_custom_call.1
= control target key start
LH: loop header
LB: loop body
LE: loop exit
PB: predicated region body
PF: predicated region fallthrough
CT: control target
= control target key end

     0   :  { %7 = vsyncpa [#allocation4], 0  ;;  %s220_s0 = inlined_call_operand.hbm [shape: f32[16,128], index: 0, kind: input, shape index: {}]   ;;  %s221_s1 = inlined_call_operand.hbm [shape: f32[16,128], index: 1, kind: input, shape index: {}]   ;;  %s222_s2 = inlined_call_operand.hbm [shape: f32[1,8,128], index: 2, kind: output, shape index: {}]  }
   0x1   :  { %8 = vsyncpa [#allocation7], 0 }
   0x2   :  { %9 = vsyncpa [#allocation5], 0  ;;  %s20_s11 = sshll.u32 %s220_s0, 4  ;;  %s191_s12 = smov [#allocation3]   ;;  %s21_s11 = int_to_ptr.hbm [resolvable:$true] %s20_s11 }
   0x3   :  { %s22_s13 = sshll.u32 %s191_s12, 4  ;;  %s39_s16 = sshll.u32 %s221_s1, 4  ;;  %s23_s13 = int_to_ptr.vmem [resolvable:$true] %s22_s13  ;;  %s40_s16 = int_to_ptr.hbm [resolvable:$true] %s39_s16 }
   0x4   :  { %s192_s17 = smov 128   ;;  %s193_s18 = smov 8  }
   0x5   :  { %28 = dma.hbm_to_vmem [thread:$0]  %s21_s11, 256, %s23_s13, [#allocation4], %s192_s17, %s192_s17, %s193_s18  }
   0x6   :  { %s194_s19 = smov [#allocation6]  }
   0x7   :  { %s41_s20 = sshll.u32 %s194_s19, 4  ;;  %s42_s20 = int_to_ptr.vmem [resolvable:$true] %s41_s20 }
   0x8   :  { %47 = dma.hbm_to_vmem [thread:$0]  %s40_s16, 256, %s42_s20, [#allocation7], %s192_s17, %s192_s17, %s193_s18  }
   0x9   :  { %185 = dma.done.wait [#allocation4], 256  }
   0xa   :  { %186 = vsyncadd [#allocation4], 4294967040 }
   0xb   :  { %187 = dma.done.wait [#allocation7], 256  }
   0xc   :  { %188 = vsyncadd [#allocation7], 4294967040  ;;  %v69_v0 = vld [vmem:[#allocation6] sm:$0xff]  ;;  %v70_v1 = vld [vmem:[#allocation6 + $0x8] sm:$0xff]  ;;  %s195_s0 = smov [#allocation8]   ;;  %s93_s23 = sshll.u32 %s222_s2, 4  ;;  %s94_s23 = int_to_ptr.hbm [resolvable:$true] %s93_s23 }
   0xd   :  { %v71_v2 = vld [vmem:[#allocation3] sm:$0xff]  ;;  %v72_v3 = vld [vmem:[#allocation3 + $0x8] sm:$0xff]  ;;  %s91_s1 = sshll.u32 %s195_s0, 4  ;;  %s92_s1 = int_to_ptr.vmem [resolvable:$true] %s91_s1 }
   0xe   :  { %v73_v4 = vsub.f32 %v69_v0, %v71_v2  ;;  %v74_v5 = vsub.f32 %v70_v1, %v72_v3 }
  0x10   :  { %v75_v6 = vmul.f32 %v73_v4, %v73_v4  ;;  %v76_v7 = vmul.f32 %v74_v5, %v74_v5 }
  0x12   :  { %v78_v8 = vadd.f32 %v76_v7, %v75_v6 }
  0x14   :  { %85 = vst [vmem:[#allocation8] sm:$0xff] %v78_v8 }
  0x15   :  { %96 = dma.vmem_to_hbm [thread:$0]  %s92_s1, 128, %s94_s23, [#allocation5]  }
  0x16   :  { %189 = dma.done.wait [#allocation5], 128  }
  0x17   :  { %190 = vsyncadd [#allocation5], 4294967168 }
  0x18   :  { %101 = vsyncpa [#allocation4], 1 }
  0x19   :  { %102 = vsyncpa [#allocation7], 1 }
  0x1a   :  { %103 = vsyncpa [#allocation5], 1 }

</bundles_post_ra>
